<compile_context>
chip_gen: v7x
topology: tpu7x:2x2x1
jax: 0.10.0
libtpu: 0.0.40
codegen_flags: <defaults>
</compile_context>

<pallas_src>
import math
import functools

import jax
import jax.numpy as jnp
from jax.experimental import pallas as pl
from jax.experimental.pallas import tpu as pltpu

# ---------------- model hyper-parameters (small, T5-style) ----------------
B = 2          # batch
S = 8          # sequence length
D_MODEL = 32   # d_model
N_HEADS = 4    # num attention heads
D_KV = 8       # key/value dim per head
INNER = N_HEADS * D_KV          # 32
NUM_BUCKETS = 32
MAX_DISTANCE = 128
LN_EPS = 1e-6


# ------------------------- relative position bias -------------------------
def _relative_position_bucket(relative_position, bidirectional=True,
                              num_buckets=32, max_distance=128):
    relative_buckets = jnp.zeros_like(relative_position)
    if bidirectional:
        num_buckets //= 2
        relative_buckets += (relative_position > 0).astype(jnp.int32) * num_buckets
        relative_position = jnp.abs(relative_position)
    else:
        relative_position = -jnp.minimum(relative_position, 0)
    max_exact = num_buckets // 2
    is_small = relative_position < max_exact
    rp_safe = jnp.maximum(relative_position, 1).astype(jnp.float32)
    relative_position_if_large = max_exact + (
        jnp.log(rp_safe / max_exact)
        / math.log(max_distance / max_exact)
        * (num_buckets - max_exact)
    ).astype(jnp.int32)
    relative_position_if_large = jnp.minimum(relative_position_if_large, num_buckets - 1)
    relative_buckets += jnp.where(is_small, relative_position, relative_position_if_large)
    return relative_buckets


def compute_position_bias(rel_attn_bias_table, q_len, k_len):
    # rel_attn_bias_table: (num_buckets, n_heads) -> (n_heads, q_len, k_len) f32
    context_position = jnp.arange(q_len, dtype=jnp.int32)[:, None]
    memory_position = jnp.arange(k_len, dtype=jnp.int32)[None, :]
    relative_position = memory_position - context_position
    buckets = _relative_position_bucket(
        relative_position, bidirectional=True,
        num_buckets=NUM_BUCKETS, max_distance=MAX_DISTANCE)
    values = rel_attn_bias_table[buckets]                        # (q, k, h)
    return jnp.transpose(values, (2, 0, 1)).astype(jnp.float32)  # (h, q, k)


# ------------------------------ Pallas kernel ------------------------------
def t5_self_attn_kernel(x_ref, wqkv_ref, wo_ref, bias_ref, out_ref,
                        *, n_heads, d_kv, inner, eps, mxu_dtype):
    """One grid step = one batch element.  x_ref: (1, S, D), bias_ref: (H, S, S)."""
    x = x_ref[0]                                        # (S, D) f32

    # --- T5 RMS layer norm (fp32 VPU math).  The learned scale (ln weight)
    #     is folded into Wqkv in the wrapper, so only rsqrt-normalize here. ---
    var = jnp.mean(x * x, axis=-1, keepdims=True)
    normed = (x * jax.lax.rsqrt(var + eps)).astype(mxu_dtype)   # (S, D)

    # --- fused QKV projection: ONE matmul with N = 3*INNER (fills the MXU),
    #     f32 accumulation on bf16 operands. ---
    qkv = jnp.dot(normed, wqkv_ref[...],
                  preferred_element_type=jnp.float32)            # (S, 3*INNER) f32

    # --- per-head attention (contraction depth d_kv is inherent to attention;
    #     this is the same MXU work as a head-batched einsum, with only one
    #     (S, S) score tile live at a time).  No 1/sqrt(d_kv) scaling in T5. ---
    ctx_heads = []
    for h in range(n_heads):
        q_h = qkv[:, 0 * inner + h * d_kv: 0 * inner + (h + 1) * d_kv].astype(mxu_dtype)
        k_h = qkv[:, 1 * inner + h * d_kv: 1 * inner + (h + 1) * d_kv].astype(mxu_dtype)
        v_h = qkv[:, 2 * inner + h * d_kv: 2 * inner + (h + 1) * d_kv].astype(mxu_dtype)

        # q @ k^T without an explicit transpose op
        s = jax.lax.dot_general(q_h, k_h, (((1,), (1,)), ((), ())),
                                preferred_element_type=jnp.float32)   # (S, S) f32
        s = s + bias_ref[h]                                            # rel-pos bias

        m = jnp.max(s, axis=-1, keepdims=True)
        e = jnp.exp(s - m)                                             # f32 (EUP)
        denom = jnp.sum(e, axis=-1, keepdims=True)
        p = e * pl.reciprocal(denom, approx=True)                      # EUP recip + VPU mul

        ctx_heads.append(jnp.dot(p.astype(mxu_dtype), v_h,
                                 preferred_element_type=jnp.float32))  # (S, d_kv)

    ctx = jnp.concatenate(ctx_heads, axis=-1)                          # (S, INNER) f32

    # --- output projection: ONE matmul with contraction depth K = INNER
    #     (no per-head (S, D) intermediates, no cross-head sum). ---
    attn = jnp.dot(ctx.astype(mxu_dtype), wo_ref[...],
                   preferred_element_type=jnp.float32)                 # (S, D) f32

    # --- residual (dropout = identity in eval mode) ---
    out_ref[0] = x + attn


# ------------------------------ wrapper ------------------------------
def t5_layer_self_attention(hidden_states, ln_weight, wq, wk, wv, wo,
                            rel_attn_bias_table, *, mxu_dtype=jnp.bfloat16):
    """hidden_states: (B, S, D) f32 -> (hidden_states_out, position_bias)."""
    bsz, seq, d_model = hidden_states.shape
    n_heads, d_kv, inner = N_HEADS, D_KV, INNER

    # relative position bias (int/table glue -> plain JAX, outside kernel)
    pos_bias = compute_position_bias(rel_attn_bias_table, seq, seq)   # (H, S, S) f32

    # Fused QKV weight with the RMS-norm scale folded in:
    #   lnw*(x*rsqrt) @ Wq  ==  (x*rsqrt) @ (diag(lnw) @ Wq)
    wqkv = jnp.concatenate([wq, wk, wv], axis=1).astype(jnp.float32)  # (D, 3*INNER)
    wqkv = (ln_weight.astype(jnp.float32)[:, None] * wqkv).astype(mxu_dtype)
    wo_c = wo.astype(mxu_dtype)                                        # (INNER, D)

    x = hidden_states.astype(jnp.float32)                              # (B, S, D)

    kernel = functools.partial(
        t5_self_attn_kernel, n_heads=n_heads, d_kv=d_kv, inner=inner,
        eps=LN_EPS, mxu_dtype=mxu_dtype)

    out = pl.pallas_call(
        kernel,
        out_shape=jax.ShapeDtypeStruct((bsz, seq, d_model), jnp.float32),
        grid=(bsz,),
        in_specs=[
            pl.BlockSpec((1, seq, d_model), lambda b: (b, 0, 0)),        # x: per-batch tile
            pl.BlockSpec((d_model, 3 * inner), lambda b: (0, 0)),        # Wqkv: shared
            pl.BlockSpec((inner, d_model), lambda b: (0, 0)),            # Wo: shared
            pl.BlockSpec((n_heads, seq, seq), lambda b: (0, 0, 0)),      # pos bias: shared
        ],
        out_specs=pl.BlockSpec((1, seq, d_model), lambda b: (b, 0, 0)),
        compiler_params=pltpu.CompilerParams(
            dimension_semantics=("parallel",)),   # batch tiles split across v7x's 2 TCs
        # TODO(synk): for long sequences add a query-row/KV grid with an
        # online-softmax (flash-style) accumulator and size blocks for v7x's
        # 64 MiB VMEM; at T5-base shapes the per-batch working set fits easily.
    )(x, wqkv, wo_c, pos_bias)

    # (hidden_states,) + attention_output[1:] -> no KV cache here, so just bias
    return out, pos_bias[None]   # position_bias as (1, H, S, S) like HF


# ------------------------------ pure-JAX reference ------------------------------
def reference(hidden_states, ln_weight, wq, wk, wv, wo, rel_attn_bias_table):
    x = hidden_states.astype(jnp.float32)
    var = jnp.mean(x * x, axis=-1, keepdims=True)
    normed = ln_weight * (x * jax.lax.rsqrt(var + LN_EPS))
    q = normed @ wq
    k = normed @ wk
    v = normed @ wv
    qh = q.reshape(B, S, N_HEADS, D_KV).transpose(0, 2, 1, 3)
    kh = k.reshape(B, S, N_HEADS, D_KV).transpose(0, 2, 1, 3)
    vh = v.reshape(B, S, N_HEADS, D_KV).transpose(0, 2, 1, 3)
    bias = compute_position_bias(rel_attn_bias_table, S, S)[None]     # (1,H,S,S)
    scores = jnp.einsum('bhqd,bhkd->bhqk', qh, kh) + bias             # no 1/sqrt(d)
    p = jax.nn.softmax(scores, axis=-1)
    ctx = jnp.einsum('bhqk,bhkd->bhqd', p, vh).transpose(0, 2, 1, 3).reshape(B, S, INNER)
    return x + ctx @ wo


# ----------------------------------- main -----------------------------------
if __name__ == "__main__":
    key = jax.random.PRNGKey(0)
    kx, kq, kk, kv, ko, kb, kl = jax.random.split(key, 7)

    hidden_states = jax.random.normal(kx, (B, S, D_MODEL), dtype=jnp.float32)
    # non-trivial LN weight so the weight-folding path is actually exercised
    ln_weight = 1.0 + 0.1 * jax.random.normal(kl, (D_MODEL,), dtype=jnp.float32)
    wq = jax.random.normal(kq, (D_MODEL, INNER), dtype=jnp.float32) * 0.05
    wk = jax.random.normal(kk, (D_MODEL, INNER), dtype=jnp.float32) * 0.05
    wv = jax.random.normal(kv, (D_MODEL, INNER), dtype=jnp.float32) * 0.05
    wo = jax.random.normal(ko, (INNER, D_MODEL), dtype=jnp.float32) * 0.05
    rel_attn_bias_table = jax.random.normal(kb, (NUM_BUCKETS, N_HEADS),
                                            dtype=jnp.float32) * 0.1

    ref = reference(hidden_states, ln_weight, wq, wk, wv, wo, rel_attn_bias_table)

    # Default path: bf16 MXU operands, f32 accumulation (native on v5e/v6e/v7x).
    out_bf16, pos_bias = t5_layer_self_attention(
        hidden_states, ln_weight, wq, wk, wv, wo, rel_attn_bias_table)
    out_bf16 = jax.block_until_ready(out_bf16)
    assert jnp.allclose(out_bf16, ref, atol=5e-2, rtol=5e-2), "bf16 kernel mismatch vs reference"

    # f32 MXU operands: only deviation from the exact f32 reference is the
    # approximate EUP reciprocal in the softmax and the LN-scale folding.
    out_f32, _ = t5_layer_self_attention(
        hidden_states, ln_weight, wq, wk, wv, wo, rel_attn_bias_table,
        mxu_dtype=jnp.float32)
    out_f32 = jax.block_until_ready(out_f32)
    assert jnp.allclose(out_f32, ref, atol=5e-3, rtol=5e-3), "fp32 kernel mismatch vs reference"

    print("KERNEL_OK")
</pallas_src>

<mosaic_0001>
module attributes {stable_mosaic.version = 11 : i64} {
  func.func @t5_self_attn_kernel(%arg0: i32, %arg1: memref<1x8x32xf32, #tpu.memory_space<vmem>>, %arg2: memref<32x96xbf16, #tpu.memory_space<vmem>>, %arg3: memref<32x32xbf16, #tpu.memory_space<vmem>>, %arg4: memref<4x8x8xf32, #tpu.memory_space<vmem>>, %arg5: memref<1x8x32xf32, #tpu.memory_space<vmem>>) attributes {dimension_semantics = [#tpu.dimension_semantics<parallel>], iteration_bounds = array<i64: 2>, scalar_prefetch = 0 : i64, scratch_operands = 0 : i64, tpu.core_type = #tpu.core_type<tc>, window_params = [{transform_indices = @transform_0, window_bounds = array<i64: 1, 8, 32>}, {pipeline_mode = #tpu.pipeline_mode<synchronous>, transform_indices = @transform_1, window_bounds = array<i64: 32, 96>}, {pipeline_mode = #tpu.pipeline_mode<synchronous>, transform_indices = @transform_2, window_bounds = array<i64: 32, 32>}, {pipeline_mode = #tpu.pipeline_mode<synchronous>, transform_indices = @transform_3, window_bounds = array<i64: 4, 8, 8>}, {transform_indices = @transform_4, window_bounds = array<i64: 1, 8, 32>}]} {
    %c0 = arith.constant 0 : index
    %c0_0 = arith.constant 0 : index
    %c0_1 = arith.constant 0 : index
    %0 = vector.load %arg1[%c0, %c0_0, %c0_1] : memref<1x8x32xf32, #tpu.memory_space<vmem>>, vector<1x8x32xf32>
    %1 = vector.shape_cast %0 : vector<1x8x32xf32> to vector<8x32xf32>
    %2 = arith.mulf %1, %1 : vector<8x32xf32>
    %cst = arith.constant dense<0.000000e+00> : vector<8xf32>
    %3 = vector.multi_reduction <add>, %2, %cst [1] : vector<8x32xf32> to vector<8xf32>
    %4 = vector.shape_cast %3 : vector<8xf32> to vector<8x1xf32>
    %cst_2 = arith.constant 3.200000e+01 : f32
    %5 = vector.broadcast %cst_2 : f32 to vector<8x1xf32>
    %6 = arith.divf %4, %5 : vector<8x1xf32>
    %cst_3 = arith.constant 9.99999997E-7 : f32
    %7 = vector.broadcast %cst_3 : f32 to vector<8x1xf32>
    %8 = arith.addf %6, %7 : vector<8x1xf32>
    %9 = math.rsqrt %8 : vector<8x1xf32>
    %10 = vector.broadcast %9 : vector<8x1xf32> to vector<8x32xf32>
    %11 = arith.mulf %1, %10 : vector<8x32xf32>
    %12 = arith.truncf %11 : vector<8x32xf32> to vector<8x32xbf16>
    %c0_4 = arith.constant 0 : index
    %c0_5 = arith.constant 0 : index
    %13 = vector.load %arg2[%c0_4, %c0_5] : memref<32x96xbf16, #tpu.memory_space<vmem>>, vector<32x96xbf16>
    %cst_6 = arith.constant dense<0.000000e+00> : vector<8x96xf32>
    %14 = tpu.matmul %12, %13, %cst_6 {dimension_numbers = #tpu.dot_dimension_numbers<[1], [0], [0], [1], [0, 0, 1, 1], [], []>} : vector<8x32xbf16>, vector<32x96xbf16>, vector<8x96xf32> -> vector<8x96xf32>
    %15 = vector.extract_strided_slice %14 {offsets = [0, 0], sizes = [8, 8], strides = [1, 1]} : vector<8x96xf32> to vector<8x8xf32>
    %16 = arith.truncf %15 : vector<8x8xf32> to vector<8x8xbf16>
    %17 = vector.extract_strided_slice %14 {offsets = [0, 32], sizes = [8, 8], strides = [1, 1]} : vector<8x96xf32> to vector<8x8xf32>
    %18 = arith.truncf %17 : vector<8x8xf32> to vector<8x8xbf16>
    %19 = vector.extract_strided_slice %14 {offsets = [0, 64], sizes = [8, 8], strides = [1, 1]} : vector<8x96xf32> to vector<8x8xf32>
    %20 = arith.truncf %19 : vector<8x8xf32> to vector<8x8xbf16>
    %cst_7 = arith.constant dense<0.000000e+00> : vector<8x8xf32>
    %21 = tpu.matmul %16, %18, %cst_7 {dimension_numbers = #tpu.dot_dimension_numbers<[1], [1], [0], [0], [0, 0, 1, 0], [], []>} : vector<8x8xbf16>, vector<8x8xbf16>, vector<8x8xf32> -> vector<8x8xf32>
    %c0_8 = arith.constant 0 : index
    %c0_9 = arith.constant 0 : index
    %c0_10 = arith.constant 0 : index
    %22 = vector.load %arg4[%c0_8, %c0_9, %c0_10] : memref<4x8x8xf32, #tpu.memory_space<vmem>>, vector<1x8x8xf32>
    %23 = vector.shape_cast %22 : vector<1x8x8xf32> to vector<8x8xf32>
    %24 = arith.addf %21, %23 : vector<8x8xf32>
    %cst_11 = arith.constant dense<0xFF800000> : vector<8xf32>
    %25 = vector.multi_reduction <maximumf>, %24, %cst_11 [1] : vector<8x8xf32> to vector<8xf32>
    %26 = vector.shape_cast %25 : vector<8xf32> to vector<8x1xf32>
    %27 = vector.broadcast %26 : vector<8x1xf32> to vector<8x8xf32>
    %28 = arith.subf %24, %27 : vector<8x8xf32>
    %29 = math.exp %28 : vector<8x8xf32>
    %cst_12 = arith.constant dense<0.000000e+00> : vector<8xf32>
    %30 = vector.multi_reduction <add>, %29, %cst_12 [1] : vector<8x8xf32> to vector<8xf32>
    %31 = vector.shape_cast %30 : vector<8xf32> to vector<8x1xf32>
    %32 = tpu.reciprocal %31 {approx = true} : vector<8x1xf32> -> vector<8x1xf32>
    %33 = vector.broadcast %32 : vector<8x1xf32> to vector<8x8xf32>
    %34 = arith.mulf %29, %33 : vector<8x8xf32>
    %35 = arith.truncf %34 : vector<8x8xf32> to vector<8x8xbf16>
    %cst_13 = arith.constant dense<0.000000e+00> : vector<8x8xf32>
    %36 = tpu.matmul %35, %20, %cst_13 {dimension_numbers = #tpu.dot_dimension_numbers<[1], [0], [0], [1], [0, 0, 1, 1], [], []>} : vector<8x8xbf16>, vector<8x8xbf16>, vector<8x8xf32> -> vector<8x8xf32>
    %37 = vector.extract_strided_slice %14 {offsets = [0, 8], sizes = [8, 8], strides = [1, 1]} : vector<8x96xf32> to vector<8x8xf32>
    %38 = arith.truncf %37 : vector<8x8xf32> to vector<8x8xbf16>
    %39 = vector.extract_strided_slice %14 {offsets = [0, 40], sizes = [8, 8], strides = [1, 1]} : vector<8x96xf32> to vector<8x8xf32>
    %40 = arith.truncf %39 : vector<8x8xf32> to vector<8x8xbf16>
    %41 = vector.extract_strided_slice %14 {offsets = [0, 72], sizes = [8, 8], strides = [1, 1]} : vector<8x96xf32> to vector<8x8xf32>
    %42 = arith.truncf %41 : vector<8x8xf32> to vector<8x8xbf16>
    %cst_14 = arith.constant dense<0.000000e+00> : vector<8x8xf32>
    %43 = tpu.matmul %38, %40, %cst_14 {dimension_numbers = #tpu.dot_dimension_numbers<[1], [1], [0], [0], [0, 0, 1, 0], [], []>} : vector<8x8xbf16>, vector<8x8xbf16>, vector<8x8xf32> -> vector<8x8xf32>
    %c1 = arith.constant 1 : index
    %c0_15 = arith.constant 0 : index
    %c0_16 = arith.constant 0 : index
    %44 = vector.load %arg4[%c1, %c0_15, %c0_16] : memref<4x8x8xf32, #tpu.memory_space<vmem>>, vector<1x8x8xf32>
    %45 = vector.shape_cast %44 : vector<1x8x8xf32> to vector<8x8xf32>
    %46 = arith.addf %43, %45 : vector<8x8xf32>
    %cst_17 = arith.constant dense<0xFF800000> : vector<8xf32>
    %47 = vector.multi_reduction <maximumf>, %46, %cst_17 [1] : vector<8x8xf32> to vector<8xf32>
    %48 = vector.shape_cast %47 : vector<8xf32> to vector<8x1xf32>
    %49 = vector.broadcast %48 : vector<8x1xf32> to vector<8x8xf32>
    %50 = arith.subf %46, %49 : vector<8x8xf32>
    %51 = math.exp %50 : vector<8x8xf32>
    %cst_18 = arith.constant dense<0.000000e+00> : vector<8xf32>
    %52 = vector.multi_reduction <add>, %51, %cst_18 [1] : vector<8x8xf32> to vector<8xf32>
    %53 = vector.shape_cast %52 : vector<8xf32> to vector<8x1xf32>
    %54 = tpu.reciprocal %53 {approx = true} : vector<8x1xf32> -> vector<8x1xf32>
    %55 = vector.broadcast %54 : vector<8x1xf32> to vector<8x8xf32>
    %56 = arith.mulf %51, %55 : vector<8x8xf32>
    %57 = arith.truncf %56 : vector<8x8xf32> to vector<8x8xbf16>
    %cst_19 = arith.constant dense<0.000000e+00> : vector<8x8xf32>
    %58 = tpu.matmul %57, %42, %cst_19 {dimension_numbers = #tpu.dot_dimension_numbers<[1], [0], [0], [1], [0, 0, 1, 1], [], []>} : vector<8x8xbf16>, vector<8x8xbf16>, vector<8x8xf32> -> vector<8x8xf32>
    %59 = vector.extract_strided_slice %14 {offsets = [0, 16], sizes = [8, 8], strides = [1, 1]} : vector<8x96xf32> to vector<8x8xf32>
    %60 = arith.truncf %59 : vector<8x8xf32> to vector<8x8xbf16>
    %61 = vector.extract_strided_slice %14 {offsets = [0, 48], sizes = [8, 8], strides = [1, 1]} : vector<8x96xf32> to vector<8x8xf32>
    %62 = arith.truncf %61 : vector<8x8xf32> to vector<8x8xbf16>
    %63 = vector.extract_strided_slice %14 {offsets = [0, 80], sizes = [8, 8], strides = [1, 1]} : vector<8x96xf32> to vector<8x8xf32>
    %64 = arith.truncf %63 : vector<8x8xf32> to vector<8x8xbf16>
    %cst_20 = arith.constant dense<0.000000e+00> : vector<8x8xf32>
    %65 = tpu.matmul %60, %62, %cst_20 {dimension_numbers = #tpu.dot_dimension_numbers<[1], [1], [0], [0], [0, 0, 1, 0], [], []>} : vector<8x8xbf16>, vector<8x8xbf16>, vector<8x8xf32> -> vector<8x8xf32>
    %c2 = arith.constant 2 : index
    %c0_21 = arith.constant 0 : index
    %c0_22 = arith.constant 0 : index
    %66 = vector.load %arg4[%c2, %c0_21, %c0_22] : memref<4x8x8xf32, #tpu.memory_space<vmem>>, vector<1x8x8xf32>
    %67 = vector.shape_cast %66 : vector<1x8x8xf32> to vector<8x8xf32>
    %68 = arith.addf %65, %67 : vector<8x8xf32>
    %cst_23 = arith.constant dense<0xFF800000> : vector<8xf32>
    %69 = vector.multi_reduction <maximumf>, %68, %cst_23 [1] : vector<8x8xf32> to vector<8xf32>
    %70 = vector.shape_cast %69 : vector<8xf32> to vector<8x1xf32>
    %71 = vector.broadcast %70 : vector<8x1xf32> to vector<8x8xf32>
    %72 = arith.subf %68, %71 : vector<8x8xf32>
    %73 = math.exp %72 : vector<8x8xf32>
    %cst_24 = arith.constant dense<0.000000e+00> : vector<8xf32>
    %74 = vector.multi_reduction <add>, %73, %cst_24 [1] : vector<8x8xf32> to vector<8xf32>
    %75 = vector.shape_cast %74 : vector<8xf32> to vector<8x1xf32>
    %76 = tpu.reciprocal %75 {approx = true} : vector<8x1xf32> -> vector<8x1xf32>
    %77 = vector.broadcast %76 : vector<8x1xf32> to vector<8x8xf32>
    %78 = arith.mulf %73, %77 : vector<8x8xf32>
    %79 = arith.truncf %78 : vector<8x8xf32> to vector<8x8xbf16>
    %cst_25 = arith.constant dense<0.000000e+00> : vector<8x8xf32>
    %80 = tpu.matmul %79, %64, %cst_25 {dimension_numbers = #tpu.dot_dimension_numbers<[1], [0], [0], [1], [0, 0, 1, 1], [], []>} : vector<8x8xbf16>, vector<8x8xbf16>, vector<8x8xf32> -> vector<8x8xf32>
    %81 = vector.extract_strided_slice %14 {offsets = [0, 24], sizes = [8, 8], strides = [1, 1]} : vector<8x96xf32> to vector<8x8xf32>
    %82 = arith.truncf %81 : vector<8x8xf32> to vector<8x8xbf16>
    %83 = vector.extract_strided_slice %14 {offsets = [0, 56], sizes = [8, 8], strides = [1, 1]} : vector<8x96xf32> to vector<8x8xf32>
    %84 = arith.truncf %83 : vector<8x8xf32> to vector<8x8xbf16>
    %85 = vector.extract_strided_slice %14 {offsets = [0, 88], sizes = [8, 8], strides = [1, 1]} : vector<8x96xf32> to vector<8x8xf32>
    %86 = arith.truncf %85 : vector<8x8xf32> to vector<8x8xbf16>
    %cst_26 = arith.constant dense<0.000000e+00> : vector<8x8xf32>
    %87 = tpu.matmul %82, %84, %cst_26 {dimension_numbers = #tpu.dot_dimension_numbers<[1], [1], [0], [0], [0, 0, 1, 0], [], []>} : vector<8x8xbf16>, vector<8x8xbf16>, vector<8x8xf32> -> vector<8x8xf32>
    %c3 = arith.constant 3 : index
    %c0_27 = arith.constant 0 : index
    %c0_28 = arith.constant 0 : index
    %88 = vector.load %arg4[%c3, %c0_27, %c0_28] : memref<4x8x8xf32, #tpu.memory_space<vmem>>, vector<1x8x8xf32>
    %89 = vector.shape_cast %88 : vector<1x8x8xf32> to vector<8x8xf32>
    %90 = arith.addf %87, %89 : vector<8x8xf32>
    %cst_29 = arith.constant dense<0xFF800000> : vector<8xf32>
    %91 = vector.multi_reduction <maximumf>, %90, %cst_29 [1] : vector<8x8xf32> to vector<8xf32>
    %92 = vector.shape_cast %91 : vector<8xf32> to vector<8x1xf32>
    %93 = vector.broadcast %92 : vector<8x1xf32> to vector<8x8xf32>
    %94 = arith.subf %90, %93 : vector<8x8xf32>
    %95 = math.exp %94 : vector<8x8xf32>
    %cst_30 = arith.constant dense<0.000000e+00> : vector<8xf32>
    %96 = vector.multi_reduction <add>, %95, %cst_30 [1] : vector<8x8xf32> to vector<8xf32>
    %97 = vector.shape_cast %96 : vector<8xf32> to vector<8x1xf32>
    %98 = tpu.reciprocal %97 {approx = true} : vector<8x1xf32> -> vector<8x1xf32>
    %99 = vector.broadcast %98 : vector<8x1xf32> to vector<8x8xf32>
    %100 = arith.mulf %95, %99 : vector<8x8xf32>
    %101 = arith.truncf %100 : vector<8x8xf32> to vector<8x8xbf16>
    %cst_31 = arith.constant dense<0.000000e+00> : vector<8x8xf32>
    %102 = tpu.matmul %101, %86, %cst_31 {dimension_numbers = #tpu.dot_dimension_numbers<[1], [0], [0], [1], [0, 0, 1, 1], [], []>} : vector<8x8xbf16>, vector<8x8xbf16>, vector<8x8xf32> -> vector<8x8xf32>
    %103 = tpu.concatenate %36, %58, %80, %102 in 1 : vector<8x8xf32>, vector<8x8xf32>, vector<8x8xf32>, vector<8x8xf32> -> vector<8x32xf32>
    %104 = arith.truncf %103 : vector<8x32xf32> to vector<8x32xbf16>
    %c0_32 = arith.constant 0 : index
    %c0_33 = arith.constant 0 : index
    %105 = vector.load %arg3[%c0_32, %c0_33] : memref<32x32xbf16, #tpu.memory_space<vmem>>, vector<32x32xbf16>
    %cst_34 = arith.constant dense<0.000000e+00> : vector<8x32xf32>
    %106 = tpu.matmul %104, %105, %cst_34 {dimension_numbers = #tpu.dot_dimension_numbers<[1], [0], [0], [1], [0, 0, 1, 1], [], []>} : vector<8x32xbf16>, vector<32x32xbf16>, vector<8x32xf32> -> vector<8x32xf32>
    %107 = arith.addf %1, %106 : vector<8x32xf32>
    %c0_35 = arith.constant 0 : index
    %c0_36 = arith.constant 0 : index
    %c0_37 = arith.constant 0 : index
    %108 = vector.load %arg5[%c0_35, %c0_36, %c0_37] : memref<1x8x32xf32, #tpu.memory_space<vmem>>, vector<1x8x32xf32>
    %109 = vector.shape_cast %108 : vector<1x8x32xf32> to vector<8x32xf32>
    %110 = vector.shape_cast %107 : vector<8x32xf32> to vector<1x8x32xf32>
    tpu.vector_store %arg5[%c0_35, %c0_36, %c0_37], %110 {strides = array<i32>} : memref<1x8x32xf32, #tpu.memory_space<vmem>>, vector<1x8x32xf32>,
    return
  }
  func.func @transform_0(%arg0: i32) -> (i32, i32, i32) {
    %c0_i32 = arith.constant 0 : i32
    %c0_i32_0 = arith.constant 0 : i32
    %c0_i32_1 = arith.constant 0 : i32
    return %arg0, %c0_i32, %c0_i32_0 : i32, i32, i32
  }
  func.func @transform_1(%arg0: i32) -> (i32, i32) {
    %c0_i32 = arith.constant 0 : i32
    %c0_i32_0 = arith.constant 0 : i32
    %c0_i32_1 = arith.constant 0 : i32
    return %c0_i32, %c0_i32_0 : i32, i32
  }
  func.func @transform_2(%arg0: i32) -> (i32, i32) {
    %c0_i32 = arith.constant 0 : i32
    %c0_i32_0 = arith.constant 0 : i32
    %c0_i32_1 = arith.constant 0 : i32
    return %c0_i32, %c0_i32_0 : i32, i32
  }
  func.func @transform_3(%arg0: i32) -> (i32, i32, i32) {
    %c0_i32 = arith.constant 0 : i32
    %c0_i32_0 = arith.constant 0 : i32
    %c0_i32_1 = arith.constant 0 : i32
    %c0_i32_2 = arith.constant 0 : i32
    return %c0_i32, %c0_i32_0, %c0_i32_1 : i32, i32, i32
  }
  func.func @transform_4(%arg0: i32) -> (i32, i32, i32) {
    %c0_i32 = arith.constant 0 : i32
    %c0_i32_0 = arith.constant 0 : i32
    %c0_i32_1 = arith.constant 0 : i32
    return %arg0, %c0_i32, %c0_i32_0 : i32, i32, i32
  }
}

</mosaic_0001>

<bundles_post_ra>
// kernel: tpu_custom_call.1
= control target key start
LH: loop header
LB: loop body
LE: loop exit
PB: predicated region body
PF: predicated region fallthrough
CT: control target
= control target key end

     0   :  { %9 = vsyncpa [#allocation3], 0  ;;  %s1786_s0 = inlined_call_operand.hbm [shape: f32[2,8,32], index: 0, kind: input, shape index: {}]   ;;  %s1787_s1 = inlined_call_operand.hbm [shape: bf16[32,96], index: 1, kind: input, shape index: {}]   ;;  %s1788_s2 = inlined_call_operand.hbm [shape: bf16[32,32], index: 2, kind: input, shape index: {}]   ;;  %s1789_s3 = inlined_call_operand.hbm [shape: f32[4,8,8], index: 3, kind: input, shape index: {}]   ;;  %s1790_s4 = inlined_call_operand.hbm [shape: f32[2,8,32], index: 4, kind: output, shape index: {}]  }
   0x1   :  { %11 = vsyncpa [#allocation3 + $0x1], 0 }
   0x2   :  { %12 = vsyncpa [#allocation6], 0 }
   0x3   :  { %13 = vsyncpa [#allocation9], 0 }
   0x4   :  { %14 = vsyncpa [#allocation4], 0 }
   0x5   :  { %16 = vsyncpa [#allocation4 + $0x1], 0  ;;  %s1447_s15 = smov 0   ;;  %s1449_s16 = smov 0  }
   0x6   :  { %s1451_s17 = smov 0   ;;  %s1453_s18 = smov 0  }
   0x7 LB: > { %s1468_s19 = sadd.s32 4294967295, %s1395_s18   ;;  %s970_s20 = sadd.s32 4294967294, %s1395_s18   ;;  %s1395_s18 = sphi %s1453_s18, %s1813_s18   ;;  %s1391_s17 = sphi %s1451_s17, %s1812_s17   ;;  %s1387_s16 = sphi %s1449_s16, %s1811_s16   ;;  %s1383_s15 = sphi %s1447_s15, %s1810_s15  }
   0x8   : > { %p42_p0 = scmp.ne.s32.totalorder %s1387_s16, %s1383_s15  ;;  %p1791_p1 = scmp.eq.s32.totalorder %s1468_s19, 0 }
   0x9   : > { %p135_p3 = scmp.eq.s32.totalorder %s970_s20, 1  ;;  %p971_p5 = scmp.ge.s32.totalorder %s1395_s18, 1 }
   0xa   : > { %p1477_p4 = por %p1791_p1, %p42_p0  ;;  %p142_p7 = scmp.lt.s32.totalorder %s1395_s18, 3 }
   0xb   : > { %p1482_p6 = por %p135_p3, %p42_p0  ;;  %s1397_s24 = smov [#allocation5]  }
   0xc   : > { %s1794_s21 = scalar_select %p1477_p4, 1, 0 }
   0xd   : > { %s1795_s22 = scalar_select %p1482_p6, 1, 0 }
   0xe   : > { %p1487_p8 = pnand %p971_p5, %p142_p7  ;;  %s154_s25 = sshll.u32 %s1397_s24, 4  ;;  %s1491_s25 = int_to_ptr.vmem [resolvable:$true] %s154_s25 }
   0xf   : > { %s1398_s27 = smov [#allocation7]   ;;  %s1399_s29 = smov [#allocation8]  }
  0x10   : > { %s1796_s23 = scalar_select %p1487_p8, 1, 0 }
  0x11   : > { %p1104_p9 = pneg %p1487_p8  ;;  %s167_s28 = sshll.u32 %s1398_s27, 4  ;;  %s1502_s28 = int_to_ptr.vmem [resolvable:$true] %s167_s28 }
  0x12   : > { %s1504_s30 = sshll.u32 %s1399_s29, 4  ;;  %s1207_s7 = scalar_lea.hbm %s1787_s1, 256  ;;  %s181_s30 = int_to_ptr.vmem [resolvable:$true] %s1504_s30 }
  0x13   : > { %p1498_p11 = pnand %p1104_p9, %p1791_p1  ;;  %p1208_p12 = scmp.ne.s32.totalorder %s1787_s1, %s1207_s7 }
  0x14   : > { %p1214_p5 = scmp.lt.u32.totalorder %s1207_s7, %s1787_s1 }
  0x15   : > { %p1514_p13 = pneg %p1498_p11 }
  0x17   : > { %p1210_p0 = pnand %p1514_p13, %p1208_p12 }
  0x19   : > { %p1211_p3 = pneg %p1210_p0 }
  0x1b   : > { %p1216_p7 = pnand %p1214_p5, %p1211_p3 }
  0x1d   : > { %1219 = shalt.err (!%p1216_p7)
}
  0x1e   : > { %s1220_s13 = scalar_lea.vmem %s1491_s25, 256  ;;  %p1228_p2 = scmp.lt.s32.totalorder %s1491_s25, %s1491_s25 }
  0x1f   : > { %p1221_p9 = scmp.ne.s32.totalorder %s1491_s25, %s1220_s13  ;;  %p1229_p6 = scmp.lt.s32.totalorder %s1220_s13, %s1220_s13 }
  0x21   : > { %p1223_p10 = pnand %p1221_p9, %p1514_p13  ;;  %p1230_p12 = por %p1229_p6, %p1228_p2 }
  0x23   : > { %p1224_p1 = pneg %p1223_p10 }
  0x25   : > { %p1231_p0 = pnand %p1230_p12, %p1224_p1 }
  0x27   : > { %1234 = shalt.err (!%p1231_p0)
}
  0x28   : > { %s1400_s14 = smov 64   ;;  %s1401_s20 = smov 4  }
  0x29   : > { %1107 = dma.hbm_to_vmem [thread:$0]  (!%p1498_p11), %s1787_s1, 256, %s1491_s25, [#allocation6], %s1400_s14, %s1400_s14, %s1401_s20  }
  0x2a   : > { %s1235_s6 = scalar_lea.hbm %s1788_s2, 256 }
  0x2b   : > { %p1236_p2 = scmp.ne.s32.totalorder %s1788_s2, %s1235_s6  ;;  %p1242_p10 = scmp.lt.u32.totalorder %s1235_s6, %s1788_s2 }
  0x2d   : > { %p1238_p1 = pnand %p1236_p2, %p1514_p13 }
  0x2f   : > { %p1239_p6 = pneg %p1238_p1 }
  0x31   : > { %p1244_p3 = pnand %p1242_p10, %p1239_p6 }
  0x33   : > { %1247 = shalt.err (!%p1244_p3)
}
  0x34   : > { %s1248_s25 = scalar_lea.vmem %s1502_s28, 256  ;;  %p1256_p12 = scmp.lt.s32.totalorder %s1502_s28, %s1502_s28 }
  0x35   : > { %p1249_p5 = scmp.ne.s32.totalorder %s1502_s28, %s1248_s25  ;;  %p1257_p0 = scmp.lt.s32.totalorder %s1248_s25, %s1248_s25 }
  0x37   : > { %p1251_p7 = pnand %p1249_p5, %p1514_p13  ;;  %p1258_p2 = por %p1257_p0, %p1256_p12 }
  0x39   : > { %p1252_p9 = pneg %p1251_p7 }
  0x3b   : > { %p1259_p1 = pnand %p1258_p2, %p1252_p9 }
  0x3d   : > { %1262 = shalt.err (!%p1259_p1)
}
  0x3e   : > { %1110 = dma.hbm_to_vmem [thread:$0]  (!%p1498_p11), %s1788_s2, 256, %s1502_s28, [#allocation6], %s1400_s14, %s1400_s14, %s1401_s20  }
  0x3f   : > { %s1263_s29 = scalar_lea.hbm %s1789_s3, 512 }
  0x40   : > { %p1264_p6 = scmp.ne.s32.totalorder %s1789_s3, %s1263_s29  ;;  %p1270_p5 = scmp.lt.u32.totalorder %s1263_s29, %s1789_s3 }
  0x42   : > { %p1266_p10 = pnand %p1264_p6, %p1514_p13 }
  0x44   : > { %p1267_p3 = pneg %p1266_p10 }
  0x46   : > { %p1272_p7 = pnand %p1270_p5, %p1267_p3 }
  0x48   : > { %1275 = shalt.err (!%p1272_p7)
}
  0x49   : > { %s1276_s9 = scalar_lea.vmem %s181_s30, 512  ;;  %p1284_p2 = scmp.lt.s32.totalorder %s181_s30, %s181_s30 }
  0x4a   : > { %p1277_p9 = scmp.ne.s32.totalorder %s181_s30, %s1276_s9  ;;  %p1285_p1 = scmp.lt.s32.totalorder %s1276_s9, %s1276_s9 }
  0x4c   : > { %p1279_p12 = pnand %p1277_p9, %p1514_p13  ;;  %p1286_p4 = por %p1285_p1, %p1284_p2 }
  0x4e   : > { %p1280_p0 = pneg %p1279_p12 }
  0x50   : > { %p1287_p8 = pnand %p1286_p4, %p1280_p0 }
  0x52   : > { %1290 = shalt.err (!%p1287_p8)
}
  0x53   : > { %s1402_s28 = smov 128   ;;  %s1403_s10 = smov 8  }
  0x54   : > { %1113 = dma.hbm_to_vmem [thread:$0]  (!%p1498_p11), %s1789_s3, 512, %s181_s30, [#allocation9], %s1402_s28, %s1402_s28, %s1403_s10  }
  0x55   : > { %s1578_s11 = sadd.s32 1, %s1395_s18   ;;  %s29_s12 = sadd.s32 1, %s1391_s17 }
  0x56   : > { %s26_s25 = ssub.s32 %s1395_s18, %s1578_s11  ;;  %p36_p8 = scmp.ne.s32.totalorder %s1391_s17, %s1387_s16 }
  0x57   : > { %p27_p4 = scmp.eq.s32.totalorder %s26_s25, 0  ;;  %p37_p13 = scmp.eq.s32.totalorder %s1395_s18, 0 }
  0x58   : > { %p1125_p6 = scmp.lt.s32.totalorder %s1395_s18, 2  ;;  %p1799_p3 = scmp.eq.s32.totalorder %s1468_s19, 1 }
  0x59   : > { %s1588_s13 = scalar_select %p27_p4, %s1391_s17, %s29_s12  }
  0x5a   : > { %p38_p10 = por %p37_p13, %p36_p8  ;;  %p1592_p5 = por %p1799_p3, %p36_p8 }
  0x5b   : > { %s194_s26 = sand.u32 1, %s1391_s17   ;;  %s977_s27 = sshll.u32 %s1395_s18, 7 }
  0x5c   : > { %s976_s30 = sshll.u32 %s194_s26, 3  ;;  %s1601_s6 = scalar_lea.hbm %s1786_s0, %s977_s27 }
  0x5d   : > { %s198_s7 = scalar_lea.vmem [#allocation2], %s976_s30  ;;  %p1603_p11 = pnand %p1125_p6, %p38_p10 }
  0x5e   : > { %s205_s8 = sshll.u32 %s198_s7, 4  ;;  %s195_s28 = scalar_lea.sflag [#allocation3], %s194_s26  ;;  %s1607_s8 = int_to_ptr.vmem [resolvable:$true] %s205_s8 }
  0x5f   : > { %s1291_s10 = scalar_lea.hbm %s1601_s6, 128  ;;  %p1293_p9 = pneg %p1603_p11 }
  0x60   : > { %p1292_p7 = scmp.ne.s32.totalorder %s1601_s6, %s1291_s10  ;;  %s1296_s25 = scalar_lea.hbm %s1786_s0, 256 }
  0x61   : > { %p1297_p2 = scmp.lt.u32.totalorder %s1601_s6, %s1786_s0  ;;  %p1298_p1 = scmp.lt.u32.totalorder %s1296_s25, %s1291_s10 }
  0x62   : > { %p1294_p12 = pnand %p1293_p9, %p1292_p7  ;;  %p1300_p8 = scmp.lt.u32.totalorder %s1291_s10, %s1601_s6 }
  0x63   : > { %p1299_p4 = por %p1298_p1, %p1297_p2 }
  0x64   : > { %p1295_p0 = pneg %p1294_p12 }
  0x65   : > { %p1301_p13 = por %p1300_p8, %p1299_p4 }
  0x67   : > { %p1302_p6 = pnand %p1301_p13, %p1295_p0 }
  0x69   : > { %1305 = shalt.err (!%p1302_p6)
}
  0x6a   : > { %s1306_s26 = scalar_lea.vmem %s1607_s8, 128  ;;  %s1404_s30 = smov [#allocation2]  }
  0x6b   : > { %p1307_p10 = scmp.ne.s32.totalorder %s1607_s8, %s1306_s26  ;;  %s1311_s29 = sshll.u32 %s1404_s30, 4  ;;  %s1312_s29 = int_to_ptr.vmem [resolvable:$false] %s1311_s29 }
  0x6c   : > { %s1313_s5 = scalar_lea.vmem %s1312_s29, 256  ;;  %p1314_p12 = scmp.lt.s32.totalorder %s1607_s8, %s1312_s29 }
  0x6d   : > { %p1309_p3 = pnand %p1307_p10, %p1293_p9  ;;  %p1315_p2 = scmp.lt.s32.totalorder %s1313_s5, %s1306_s26 }
  0x6f   : > { %p1310_p7 = pneg %p1309_p3  ;;  %p1316_p1 = por %p1315_p2, %p1314_p12 }
  0x71   : > { %p1317_p4 = pnand %p1316_p1, %p1310_p7 }
  0x73   : > { %1320 = shalt.err (!%p1317_p4)
}
  0x74   : > { %1117 = dma.hbm_to_vmem [thread:$0]  (!%p1603_p11), %s1601_s6, 128, %s1607_s8, %s195_s28  }
  0x75   : > { %p1802_p0 = scmp.ne.s32.totalorder %s1796_s23, 0 }
  0x76   : > { %s1637_s7 = sand.u32 (!%p1802_p0), 1, %s1387_s16   ;;  %p1803_p9 = scmp.ne.s32.totalorder (!%p1802_p0), %s1794_s21, 0 }
  0x77   : > { %214 = sbr.rel (%p1802_p0) target bundleno = 1786 (0x6fa), region = 36  ;;  %s979_s10 = sshll.u32 (!%p1802_p0), %s1637_s7, 3 }
  0x78   : > { %s217_s14 = scalar_lea.sflag (!%p1802_p0), [#allocation3], %s1637_s7  ;;  %s220_s20 = scalar_lea.vmem (!%p1802_p0), [#allocation2], %s979_s10 }
  0x7e   : > { %1366 = dma.done.wait (%p1803_p9), %s217_s14, 128  }
  0x7f   : > { %1368 = vsyncadd (%p1803_p9), %s217_s14, 4294967168  ;;  %p1804_p11 = scmp.eq.s32.totalorder %s1468_s19, 0 }
  0x81   : > { %1370 = dma.done.wait (%p1804_p11), [#allocation6], 512   ;;  %p1805_p8 = pmov %p1804_p11 }
  0x83   : > { %1372 = vsyncadd (%p1805_p8), [#allocation6], 4294966784  ;;  %p1806_p13 = pmov %p1805_p8 }
  0x84   : > { %p1807_p6 = pmov %p1805_p8 }
  0x85   : > { %1374 = dma.done.wait (%p1806_p13), [#allocation9], 512  }
  0x86   : > { %1376 = vsyncadd (%p1807_p6), [#allocation9], 4294966784  ;;  %v1655_v0 = vld [vmem:[%s220_s20] sm:$0xff]  ;;  %vm260_vm0 = vcmask 261120   ;;  %v1185_v3 = vld [vmem:[#allocation5] sm:$0xff]   ;;  %v1405_v4 = vmov 0.0  }
  0x87   : > { %v259_v1 = vmul.f32 %v1655_v0, %v1655_v0  ;;  %1024 = vmatprep.subr.bf16.mxu0 %v1405_v4  ;;  %vm1406_vm1 = vmmov 0   ;;  %v1186_v5 = vld [vmem:[#allocation5 + $0x8] sm:$0xff]   ;;  %1032 = vmatprep.subr.bf16.mxu1 %v1405_v4  ;;  %s1407_s21 = smov 88   ;;  %s1408_s23 = smov 96   ;;  %vm334_vm2 = vcmask 64512   ;;  %v330_v28 = vld [vmem:[#allocation8] sm:$0xff] }
  0x88   : > { %1028 = vmatprep.mubr.msk.bf16.mxu0 %vm1406_vm1, %v1405_v4  ;;  %1025 = vmatpush3.bf16.msra.mxu0 %v1185_v3  ;;  %s1409_s6 = smov 120   ;;  %s1410_s8 = smov 80   ;;  %v443_v35 = vld [vmem:[#allocation8 + $0x8] sm:$0xff]  ;;  %v555_v42 = vld [vmem:[#allocation8 + $0x10] sm:$0xff]  ;;  %v667_v49 = vld [vmem:[#allocation8 + $0x18] sm:$0xff]  ;;  %vm398_vm3 = vcmask 1043456  }
  0x89   : > { %v261_v2 = vsel %vm260_vm0, %v259_v1, 0.0  ;;  %1026 = vmatprep.subr.bf16.mxu0 %v1405_v4  ;;  %1034 = vmatprep.mubr.msk.bf16.mxu1 %vm1406_vm1, %v1405_v4  ;;  %s1411_s9 = smov 112   ;;  %s1412_s28 = smov 72   ;;  %vm791_vm4 = vcmask 130048   ;;  %vm793_vm5 = vcmask 195584  }
  0x8a   : > { %262 = vadd.xlane.f32.xlu0 %v261_v2  ;;  %s1413_s25 = smov 104   ;;  %s1414_s12 = smov 56  }
  0x8b   : > { %s1415_s27 = smov 64   ;;  %s1416_s26 = smov 40  }
  0x8c   : > { %1027 = vmatpush3.bf16.msra.mxu0 %v1186_v5  ;;  %s1417_s30 = smov 48   ;;  %s1418_s29 = smov 8  }
  0x8d   : > { %1038 = vmatprep.subr.bf16.mxu0 %v1405_v4  ;;  %s1419_s5 = smov 16   ;;  %s1420_s14 = smov 24  }
  0x8e   : > { %s999_s20 = sshll.u32 %s1468_s19, 7  ;;  %s858_s19 = scalar_lea.sflag [#allocation4], %s1637_s7 }
 0x117   : > { %v263_v6 = vpop.xlane.xlu0 %262 }
 0x118   : > { %v265_v7 = vmul.f32 0.03125, %v263_v6 }
 0x11a   : > { %v266_v8 = vadd.f32 1e-06, %v265_v7 }
 0x11c   : > { %1189 = vrsqrt.f32 %v266_v8 }
 0x126   : > { %v1190_v9 = vpop.eup %1189 }
 0x127   : > { %v268_v10 = vmul.f32 %v1190_v9, %v1655_v0 }
 0x129   : > { %v269_v11 = vpack.c.bf16 %v268_v10, %v268_v10 }
 0x12b   : > { %1029 = vmatmul.mubr.msk.bf16.vlgmr.msra.gmra.mrb[0].mxu0 %vm260_vm0, %v269_v11 }
 0x12c   : > { %1040 = vmatprep.mubr.msk.bf16.mxu0 %vm1406_vm1, %v1405_v4 }
 0x1fe   : > { %v323_v12 = vpop.f32.mrb[0].mxu0 }
 0x1ff   : > { %v1672_v13 = vpack.c.bf16 %v323_v12, %v323_v12  ;;  %v1030_v14 = vpop.f32.mrb[1].mxu0 }
 0x200   : > { %v326_v15 = vpop.f32.mrb[2].mxu0 }
 0x201   : > { %446 = vrot.lane.b32.xlu1 %v1672_v13, %s1407_s21  ;;  %332 = vrot.lane.b32.xlu0 %v1672_v13, %s1408_s23  ;;  %v1031_v16 = vpop.f32.mrb[3].mxu0  ;;  %s256_s21 = scalar_lea.vmem [#allocation10], %s979_s10 }
 0x202   : > { %s871_s23 = sshll.u32 %s256_s21, 4  ;;  %s1743_s23 = int_to_ptr.vmem [resolvable:$true] %s871_s23 }
 0x203   : > { %s1321_s10 = scalar_lea.vmem %s1743_s23, 128 }
 0x204   : > { %p1322_p10 = scmp.ne.s32.totalorder %s1743_s23, %s1321_s10 }
 0x205   : > { %444 = vrot.lane.b32.xlu1 %v1672_v13, %s1409_s6 }
 0x206   : > { %p1323_p3 = pnand %p1322_p10, %p1592_p5 }
 0x208   : > { %p1324_p7 = pneg %p1323_p3 }
 0x209   : > { %558 = vrot.lane.b32.xlu1 %v1672_v13, %s1410_s8 }
 0x20d   : > { %556 = vrot.lane.b32.xlu1 %v1672_v13, %s1411_s9  ;;  %s1741_s9 = scalar_lea.hbm %s1790_s4, %s999_s20 }
 0x211   : > { %670 = vrot.lane.b32.xlu1 %v1672_v13, %s1412_s28  ;;  %s1421_s28 = smov [#allocation10]  }
 0x215   : > { %668 = vrot.lane.b32.xlu1 %v1672_v13, %s1413_s25  ;;  %s1325_s25 = sshll.u32 %s1421_s28, 4  ;;  %s1326_s25 = int_to_ptr.vmem [resolvable:$false] %s1325_s25 }
 0x216   : > { %p1328_p12 = scmp.lt.s32.totalorder %s1743_s23, %s1326_s25 }
 0x273   : > { %v447_v17 = vpop.permute.xlu1 %446  ;;  %v333_v18 = vpop.permute.xlu0 %332 }
 0x274   : > { %v339_v19 = vsel %vm334_vm2, %v333_v18, 0  ;;  %v452_v21 = vsel %vm334_vm2, %v447_v17, 0 }
 0x275   : > { %1033 = vmatpush3.bf16.xpose.msra.mxu1 %v339_v19 }
 0x276   : > { %1044 = vmatprep.subr.bf16.mxu1 %v1405_v4 }
 0x277   : > { %v445_v20 = vpop.permute.xlu1 %444 }
 0x27b   : > { %v559_v22 = vpop.permute.xlu1 %558 }
 0x27c   : > { %1035 = vmatmul.mubr.msk.bf16.vlgmr.msra.gmra.mrb[0].mxu1 %vm334_vm2, %v1672_v13  ;;  %v564_v24 = vsel %vm334_vm2, %v559_v22, 0 }
 0x27d   : > { %1045 = vmatpush3.bf16.xpose.msra.mxu1 %v452_v21  ;;  %1046 = vmatprep.mubr.msk.bf16.mxu1 %vm1406_vm1, %v1405_v4 }
 0x27e   : > { %1056 = vmatprep.subr.bf16.mxu1 %v1405_v4 }
 0x27f   : > { %v557_v23 = vpop.permute.xlu1 %556 }
 0x283   : > { %v671_v25 = vpop.permute.xlu1 %670 }
 0x284   : > { %1047 = vmatmul.mubr.msk.bf16.vlgmr.msra.gmra.mrb[4].mxu1 %vm334_vm2, %v445_v20  ;;  %v676_v26 = vsel %vm334_vm2, %v671_v25, 0 }
 0x285   : > { %1057 = vmatpush3.bf16.xpose.msra.mxu1 %v564_v24  ;;  %1058 = vmatprep.mubr.msk.bf16.mxu1 %vm1406_vm1, %v1405_v4 }
 0x286   : > { %1068 = vmatprep.subr.bf16.mxu1 %v1405_v4 }
 0x287   : > { %v669_v27 = vpop.permute.xlu1 %668 }
 0x28c   : > { %1059 = vmatmul.mubr.msk.bf16.vlgmr.msra.gmra.mrb[8].mxu1 %vm334_vm2, %v557_v23 }
 0x28d   : > { %1069 = vmatpush3.bf16.xpose.msra.mxu1 %v676_v26  ;;  %1070 = vmatprep.mubr.msk.bf16.mxu1 %vm1406_vm1, %v1405_v4 }
 0x28e   : > { %1080 = vmatprep.subr.bf16.mxu1 %v1405_v4 }
 0x294   : > { %1071 = vmatmul.mubr.msk.bf16.vlgmr.msra.gmra.mrb[12].mxu1 %vm334_vm2, %v669_v27 }
 0x295   : > { %1084 = vmatprep.mubr.msk.bf16.mxu1 %vm1406_vm1, %v1405_v4 }
 0x34f   : > { %v375_v29 = vpop.f32.mrb[0].mxu1 }
 0x350   : > { %v376_v30 = vadd.f32 %v375_v29, %v330_v28  ;;  %v1036_v31 = vpop.f32.mrb[1].mxu1 }
 0x351   : > { %v378_v32 = vpop.f32.mrb[2].mxu1 }
 0x352   : > { %v1037_v33 = vpop.f32.mrb[3].mxu1  ;;  %v381_v34 = vsel %vm334_vm2, %v376_v30, -inf }
 0x353   : > { %382 = vmax.xlane.f32.xlu1 %v381_v34 }
 0x357   : > { %v488_v36 = vpop.f32.mrb[4].mxu1 }
 0x358   : > { %v489_v37 = vadd.f32 %v488_v36, %v443_v35  ;;  %v1048_v38 = vpop.f32.mrb[5].mxu1 }
 0x359   : > { %v491_v39 = vpop.f32.mrb[6].mxu1 }
 0x35a   : > { %v1049_v40 = vpop.f32.mrb[7].mxu1  ;;  %v494_v41 = vsel %vm334_vm2, %v489_v37, -inf }
 0x35b   : > { %495 = vmax.xlane.f32.xlu0 %v494_v41 }
 0x35f   : > { %v600_v43 = vpop.f32.mrb[8].mxu1 }
 0x360   : > { %v601_v44 = vadd.f32 %v600_v43, %v555_v42  ;;  %v1060_v45 = vpop.f32.mrb[9].mxu1 }
 0x361   : > { %v603_v46 = vpop.f32.mrb[10].mxu1 }
 0x362   : > { %v1061_v47 = vpop.f32.mrb[11].mxu1  ;;  %v606_v48 = vsel %vm334_vm2, %v601_v44, -inf  ;;  %v1187_v46 = vld [vmem:[#allocation7] sm:$0xff]  }
 0x363   : > { %607 = vmax.xlane.f32.xlu0 %v606_v48  ;;  %1081 = vmatpush3.bf16.msra.mxu1 %v1187_v46  ;;  %v1188_v47 = vld [vmem:[#allocation7 + $0x8] sm:$0xff]  }
 0x364   : > { %1082 = vmatprep.subr.bf16.mxu1 %v1405_v4 }
 0x367   : > { %v712_v50 = vpop.f32.mrb[12].mxu1  ;;  %1083 = vmatpush3.bf16.msra.mxu1 %v1188_v47 }
 0x368   : > { %v713_v51 = vadd.f32 %v712_v50, %v667_v49  ;;  %v1072_v52 = vpop.f32.mrb[13].mxu1 }
 0x369   : > { %v715_v53 = vpop.f32.mrb[14].mxu1 }
 0x36a   : > { %v1073_v54 = vpop.f32.mrb[15].mxu1  ;;  %v718_v55 = vsel %vm334_vm2, %v713_v51, -inf }
 0x36b   : > { %719 = vmax.xlane.f32.xlu1 %v718_v55 }
 0x3e0   : > { %v383_v56 = vpop.xlane.xlu1 %382 }
 0x3e1   : > { %v384_v57 = vsub.f32 %v376_v30, %v383_v56 }
 0x3e3   : > { %v385_v58 = vmul.f32 1.442695, %v384_v57 }
 0x3e5   : > { %1191 = vpow2.f32 %v385_v58 }
 0x3e8   : > { %v496_v59 = vpop.xlane.xlu0 %495 }
 0x3e9   : > { %v497_v60 = vsub.f32 %v489_v37, %v496_v59 }
 0x3eb   : > { %v498_v61 = vmul.f32 1.442695, %v497_v60 }
 0x3ed   : > { %1193 = vpow2.f32 %v498_v61 }
 0x3ef   : > { %v1192_v62 = vpop.eup %1191 }
 0x3f0   : > { %v608_v63 = vpop.xlane.xlu0 %607  ;;  %v387_v1 = vsel %vm334_vm2, %v1192_v62, 0.0 }
 0x3f1   : > { %v609_v2 = vsub.f32 %v601_v44, %v608_v63  ;;  %388 = vadd.xlane.f32.xlu0 %v387_v1 }
 0x3f3   : > { %v610_v3 = vmul.f32 1.442695, %v609_v2 }
 0x3f5   : > { %1195 = vpow2.f32 %v610_v3 }
 0x3f7   : > { %v1194_v5 = vpop.eup %1193 }
 0x3f8   : > { %v500_v6 = vsel %vm334_vm2, %v1194_v5, 0.0  ;;  %v720_v9 = vpop.xlane.xlu1 %719 }
 0x3f9   : > { %501 = vadd.xlane.f32.xlu1 %v500_v6  ;;  %v721_v10 = vsub.f32 %v713_v51, %v720_v9 }
 0x3fb   : > { %v722_v11 = vmul.f32 1.442695, %v721_v10 }
 0x3fd   : > { %1197 = vpow2.f32 %v722_v11 }
 0x3ff   : > { %v1196_v7 = vpop.eup %1195 }
 0x400   : > { %v612_v8 = vsel %vm334_vm2, %v1196_v7, 0.0 }
 0x401   : > { %613 = vadd.xlane.f32.xlu0 %v612_v8 }
 0x407   : > { %v1198_v12 = vpop.eup %1197 }
 0x408   : > { %v724_v14 = vsel %vm334_vm2, %v1198_v12, 0.0 }
 0x40a   : > { %506 = vrot.lane.b32.xlu1 %v1672_v13, %s1414_s12  ;;  %s1327_s12 = scalar_lea.vmem %s1326_s25, 256 }
 0x40b   : > { %p1329_p2 = scmp.lt.s32.totalorder %s1327_s12, %s1321_s10 }
 0x40d   : > { %p1330_p1 = por %p1329_p2, %p1328_p12 }
 0x40f   : > { %p1331_p4 = pnand %p1330_p1, %p1324_p7 }
 0x417   : > { %393 = vrot.lane.b32.xlu0 %v1672_v13, %s1415_s27 }
 0x41b   : > { %730 = vrot.lane.b32.xlu0 %v1672_v13, %s1416_s26 }
 0x42e   : > { %725 = vadd.xlane.f32.xlu1 %v724_v14 }
 0x43f   : > { %618 = vrot.lane.b32.xlu1 %v1672_v13, %s1417_s30 }
 0x47e   : > { %v389_v15 = vpop.xlane.xlu0 %388 }
 0x47f   : > { %1199 = vrcp.f32 %v389_v15 }
 0x486   : > { %v502_v16 = vpop.xlane.xlu1 %501 }
 0x487   : > { %1201 = vrcp.f32 %v502_v16 }
 0x489   : > { %v1200_v17 = vpop.eup %1199 }
 0x48a   : > { %v391_v19 = vmul.f32 %v1200_v17, %v1192_v62  ;;  %v507_v22 = vpop.permute.xlu1 %506 }
 0x48b   : > { %v512_v25 = vsel %vm398_vm3, %v507_v22, 0 }
 0x48c   : > { %v392_v23 = vpack.c.bf16 %v391_v19, %v391_v19 }
 0x48e   : > { %v614_v18 = vpop.xlane.xlu0 %613 }
 0x48f   : > { %1203 = vrcp.f32 %v614_v18 }
 0x491   : > { %v1202_v24 = vpop.eup %1201 }
 0x492   : > { %v394_v20 = vpop.permute.xlu0 %393  ;;  %v504_v13 = vmul.f32 %v1202_v24, %v1194_v5 }
 0x493   : > { %v400_v21 = vsel %vm398_vm3, %v394_v20, 0 }
 0x494   : > { %1039 = vmatpush3.bf16.msra.mxu0 %v400_v21  ;;  %v505_v26 = vpack.c.bf16 %v504_v13, %v504_v13 }
 0x495   : > { %1050 = vmatprep.subr.bf16.mxu0 %v1405_v4 }
 0x496   : > { %v731_v32 = vpop.permute.xlu0 %730 }
 0x497   : > { %1041 = vmatmul.mubr.msk.bf16.vlgmr.msra.gmra.mrb[4].mxu0 %vm334_vm2, %v392_v23  ;;  %v736_v34 = vsel %vm398_vm3, %v731_v32, 0 }
 0x498   : > { %1051 = vmatpush3.bf16.msra.mxu0 %v512_v25  ;;  %1052 = vmatprep.mubr.msk.bf16.mxu0 %vm1406_vm1, %v1405_v4 }
 0x499   : > { %1062 = vmatprep.subr.bf16.mxu0 %v1405_v4  ;;  %v1204_v27 = vpop.eup %1203 }
 0x49a   : > { %v616_v29 = vmul.f32 %v1204_v27, %v1196_v7 }
 0x49c   : > { %v617_v33 = vpack.c.bf16 %v616_v29, %v616_v29 }
 0x49f   : > { %1053 = vmatmul.mubr.msk.bf16.vlgmr.msra.gmra.mrb[8].mxu0 %vm334_vm2, %v505_v26 }
 0x4a0   : > { %1064 = vmatprep.mubr.msk.bf16.mxu0 %vm1406_vm1, %v1405_v4 }
 0x4bb   : > { %v726_v28 = vpop.xlane.xlu1 %725 }
 0x4bc   : > { %1205 = vrcp.f32 %v726_v28 }
 0x4bf   : > { %v619_v30 = vpop.permute.xlu1 %618 }
 0x4c0   : > { %v624_v31 = vsel %vm398_vm3, %v619_v30, 0 }
 0x4c1   : > { %1063 = vmatpush3.bf16.msra.mxu0 %v624_v31 }
 0x4c2   : > { %1074 = vmatprep.subr.bf16.mxu0 %v1405_v4 }
 0x4c4   : > { %1065 = vmatmul.mubr.msk.bf16.vlgmr.msra.gmra.mrb[12].mxu0 %vm334_vm2, %v617_v33 }
 0x4c5   : > { %1075 = vmatpush3.bf16.msra.mxu0 %v736_v34  ;;  %1076 = vmatprep.mubr.msk.bf16.mxu0 %vm1406_vm1, %v1405_v4 }
 0x4c6   : > { %v1206_v35 = vpop.eup %1205 }
 0x4c7   : > { %v728_v36 = vmul.f32 %v1206_v35, %v1198_v12 }
 0x4c9   : > { %v729_v37 = vpack.c.bf16 %v728_v36, %v728_v36 }
 0x4cc   : > { %1077 = vmatmul.mubr.msk.bf16.vlgmr.msra.gmra.mrb[16].mxu0 %vm334_vm2, %v729_v37 }
 0x56a   : > { %v436_v38 = vpop.f32.mrb[4].mxu0 }
 0x56b   : > { %v1042_v39 = vpop.f32.mrb[5].mxu0 }
 0x56c   : > { %v439_v40 = vpop.f32.mrb[6].mxu0 }
 0x56d   : > { %v1043_v41 = vpop.f32.mrb[7].mxu0 }
 0x572   : > { %v548_v42 = vpop.f32.mrb[8].mxu0 }
 0x573   : > { %779 = vrot.lane.b32.xlu1 %v548_v42, %s1418_s29  ;;  %v1054_v43 = vpop.f32.mrb[9].mxu0 }
 0x574   : > { %v551_v44 = vpop.f32.mrb[10].mxu0 }
 0x575   : > { %v1055_v45 = vpop.f32.mrb[11].mxu0 }
 0x597   : > { %v660_v48 = vpop.f32.mrb[12].mxu0 }
 0x598   : > { %783 = vrot.lane.b32.xlu0 %v660_v48, %s1419_s5  ;;  %v1066_v49 = vpop.f32.mrb[13].mxu0 }
 0x599   : > { %v663_v50 = vpop.f32.mrb[14].mxu0 }
 0x59a   : > { %v1067_v51 = vpop.f32.mrb[15].mxu0 }
 0x59f   : > { %v772_v52 = vpop.f32.mrb[16].mxu0 }
 0x5a0   : > { %787 = vrot.lane.b32.xlu1 %v772_v52, %s1420_s14  ;;  %v1078_v53 = vpop.f32.mrb[17].mxu0 }
 0x5a1   : > { %v775_v54 = vpop.f32.mrb[18].mxu0 }
 0x5a2   : > { %v1079_v55 = vpop.f32.mrb[19].mxu0 }
 0x5e5   : > { %v780_v56 = vpop.permute.xlu1 %779 }
 0x5e6   : > { %v790_v4 = vsel %vm334_vm2, %v436_v38, %v780_v56 }
 0x60a   : > { %v784_v57 = vpop.permute.xlu0 %783 }
 0x60b   : > { %v792_v58 = vsel %vm791_vm4, %v790_v4, %v784_v57 }
 0x612   : > { %v788_v59 = vpop.permute.xlu1 %787 }
 0x613   : > { %v794_v60 = vsel %vm793_vm5, %v792_v58, %v788_v59 }
 0x614   : > { %v795_v61 = vpack.c.bf16 %v794_v60, %v794_v60 }
 0x616   : > { %1085 = vmatmul.mubr.msk.bf16.vlgmr.msra.gmra.mrb[16].mxu1 %vm260_vm0, %v795_v61 }
 0x6e9   : > { %v849_v62 = vpop.f32.mrb[16].mxu1 }
 0x6ea   : > { %v855_v63 = vadd.f32 %v849_v62, %v1655_v0  ;;  %v1086_v1 = vpop.f32.mrb[17].mxu1 }
 0x6eb   : > { %v852_v2 = vpop.f32.mrb[18].mxu1 }
 0x6ec   : > { %v1087_v3 = vpop.f32.mrb[19].mxu1  ;;  %856 = vst.msk [vmem:[%s256_s21] sm:$0xff] %vm260_vm0, %v855_v63 }
 0x6ed   : > { %1334 = shalt.err (!%p1331_p4)
}
 0x6ee   : > { %s1335_s7 = scalar_lea.hbm %s1741_s9, 128  ;;  %s1339_s30 = scalar_lea.hbm %s1790_s4, 256 }
 0x6ef   : > { %p1336_p0 = scmp.ne.s32.totalorder %s1741_s9, %s1335_s7  ;;  %p1340_p8 = scmp.lt.u32.totalorder %s1741_s9, %s1790_s4 }
 0x6f0   : > { %p1341_p13 = scmp.lt.u32.totalorder %s1339_s30, %s1335_s7  ;;  %p1343_p10 = scmp.lt.u32.totalorder %s1335_s7, %s1741_s9 }
 0x6f1   : > { %p1337_p9 = pnand %p1336_p0, %p1592_p5 }
 0x6f2   : > { %p1342_p6 = por %p1341_p13, %p1340_p8 }
 0x6f3   : > { %p1338_p11 = pneg %p1337_p9 }
 0x6f4   : > { %p1344_p3 = por %p1343_p10, %p1342_p6 }
 0x6f6   : > { %p1345_p7 = pnand %p1344_p3, %p1338_p11 }
 0x6f8   : > { %1348 = shalt.err (!%p1345_p7)
}
 0x6f9   : > { %1102 = dma.vmem_to_hbm [thread:$0]  (%p1592_p5), %s1743_s23, 128, %s1741_s9, %s858_s19  }
 0x6fa PF: > { %s883_s14 = sand.u32 1, %s1383_s15   ;;  %p1808_p12 = scmp.ne.s32.totalorder %s1795_s22, 0 }
 0x6fb   : > { %p1809_p2 = scmp.ge.s32.totalorder %s1395_s18, 2  ;;  %s884_s20 = scalar_lea.sflag [#allocation4], %s883_s14 }
 0x6fd   : > { %p1119_p1 = pnand %p1809_p2, %p1808_p12 }
 0x6ff   : > { %1378 = dma.done.wait (!%p1119_p1), %s884_s20, 128  }
 0x700   : > { %1380 = vsyncadd (!%p1119_p1), %s884_s20, 4294967168  ;;  %p19_p4 = scmp.ge.s32.totalorder %s1578_s11, 4   ;;  %s1810_s15 = smov %s1387_s16 }
 0x701   : > { %s1811_s16 = smov %s1391_s17  ;;  %s1812_s17 = smov %s1588_s13 }
 0x702   : > { %s1813_s18 = smov %s1578_s11  ;;  %21 = sbr.rel (!%p19_p4) target bundleno = 7 (0x7), region = 96 }
 0x709   :  { %889 = vsyncpa [#allocation3], 1 }
 0x70a   :  { %891 = vsyncpa [#allocation3 + $0x1], 1 }
 0x70b   :  { %892 = vsyncpa [#allocation6], 1 }
 0x70c   :  { %893 = vsyncpa [#allocation9], 1 }
 0x70d   :  { %894 = vsyncpa [#allocation4], 1 }
 0x70e   :  { %896 = vsyncpa [#allocation4 + $0x1], 1 }

</bundles_post_ra>
